<compile_context>
chip_gen: v6e
topology: v6e:2x2x1
jax: 0.10.0
libtpu: 0.0.40
codegen_flags: <defaults>
</compile_context>

<pallas_src>
import jax
import jax.numpy as jnp
from jax.experimental import pallas as pl
from jax.experimental.pallas import tpu as pltpu


def _swin_head_kernel(x_ref, w_ref, b_ref, o_ref):
    # x_ref: (bn, L, C)   tokens on sublanes, channels on lanes
    # w_ref: (C, E)       embedding weight (transposed nn.Linear layout)
    # b_ref: (1, E)       embedding bias
    # o_ref: (bn, E)      lane-dense output
    x = x_ref[...].astype(jnp.float32)
    l = x.shape[1]
    # mean + max over the token axis, accumulated in f32 (VPU work).
    pooled = jnp.sum(x, axis=1) * (1.0 / l) + jnp.max(x, axis=1)   # (bn, C)
    # Fused embedding matmul on the MXU with f32 accumulation.
    out = jnp.dot(pooled, w_ref[...].astype(jnp.float32),
                  preferred_element_type=jnp.float32)              # (bn, E)
    out = out + b_ref[...].astype(jnp.float32)
    o_ref[...] = out.astype(o_ref.dtype)


def _choose_block_n(n, l, c, itemsize):
    """Largest batch tile whose double-buffered input stays well inside VMEM."""
    # ~4 MiB per input buffer (x2 for BlockSpec double buffering) leaves large
    # headroom under the default scoped VMEM limit on v5e / v6e / v7x (64 MiB
    # physical on v7x), while being big enough to amortize per-step overhead.
    row_bytes = max(l * c * itemsize, 1)
    bn = max(1, (4 * 1024 * 1024) // row_bytes)
    if bn >= n:
        return n                      # single full-extent block: one DMA in/out
    bn = max(8, (bn // 8) * 8)        # keep (bn, E) output blocks sublane-aligned
    return min(bn, n)


def swin_head(x, w, b, *, block_n=None):
    """pooled = mean(x, 1) + max(x, 1); return pooled @ w + b.

    x: (N, L, C) backbone features, w: (C, E), b: (E,).
    """
    n, l, c = x.shape
    cw, e = w.shape
    assert cw == c, (cw, c)

    if block_n is None:
        block_n = _choose_block_n(n, l, c, x.dtype.itemsize)
    block_n = min(block_n, n)

    b2d = b.reshape(1, e)
    grid = (pl.cdiv(n, block_n),)

    return pl.pallas_call(
        _swin_head_kernel,
        out_shape=jax.ShapeDtypeStruct((n, e), x.dtype),
        grid_spec=pltpu.PrefetchScalarGridSpec(
            num_scalar_prefetch=0,
            grid=grid,
            in_specs=[
                pl.BlockSpec((block_n, l, c), lambda i: (i, 0, 0)),
                pl.BlockSpec((c, e), lambda i: (0, 0)),
                pl.BlockSpec((1, e), lambda i: (0, 0)),
            ],
            out_specs=pl.BlockSpec((block_n, e), lambda i: (i, 0)),
        ),
        compiler_params=pltpu.CompilerParams(
            # Parallel batch axis so v7x's two TensorCores each take a share.
            dimension_semantics=("parallel",),
        ),
    )(x, w, b2d)


def swin_head_ref(x, w, b):
    xf = x.astype(jnp.float32)
    pooled = jnp.mean(xf, axis=1) + jnp.max(xf, axis=1)
    return (pooled @ w.astype(jnp.float32) + b.astype(jnp.float32)).astype(x.dtype)


if __name__ == "__main__":
    key = jax.random.PRNGKey(0)
    kx, kw, kb, kx2 = jax.random.split(key, 4)

    # Small shapes consistent with the module's head:
    # features (batch=2, seq=8, hidden=32) -> embedding dim 16.
    N, L, C, E = 2, 8, 32, 16
    x = jax.random.normal(kx, (N, L, C), dtype=jnp.float32)
    w = jax.random.normal(kw, (C, E), dtype=jnp.float32) * 0.05
    b = jax.random.normal(kb, (E,), dtype=jnp.float32) * 0.05

    out = jax.block_until_ready(swin_head(x, w, b))
    ref = swin_head_ref(x, w, b)
    assert out.shape == (N, E), out.shape
    assert jnp.allclose(out, ref, atol=2e-2, rtol=2e-2), "mismatch vs reference (small)"

    # Real Swin-Tiny head shape (N, 49, 768) -> 512, with a batch large enough
    # to exercise the tiled (grid > 1) path including a ragged tail block.
    N2, L2, C2, E2 = 64, 49, 768, 512
    x2 = jax.random.normal(kx2, (N2, L2, C2), dtype=jnp.float32)
    w2 = jax.random.normal(kw, (C2, E2), dtype=jnp.float32) * 0.02
    b2 = jax.random.normal(kb, (E2,), dtype=jnp.float32) * 0.02

    out2 = jax.block_until_ready(swin_head(x2, w2, b2))
    ref2 = swin_head_ref(x2, w2, b2)
    assert out2.shape == (N2, E2), out2.shape
    assert jnp.allclose(out2, ref2, atol=5e-2, rtol=1e-2), "mismatch vs reference (large)"

    print("KERNEL_OK")
</pallas_src>

<mosaic_0001>
module attributes {stable_mosaic.version = 11 : i64} {
  func.func @_swin_head_kernel(%arg0: i32, %arg1: memref<2x8x32xf32, #tpu.memory_space<vmem>>, %arg2: memref<32x16xf32, #tpu.memory_space<vmem>>, %arg3: memref<1x16xf32, #tpu.memory_space<vmem>>, %arg4: memref<2x16xf32, #tpu.memory_space<vmem>>) attributes {dimension_semantics = [#tpu.dimension_semantics<parallel>], iteration_bounds = array<i64: 1>, scalar_prefetch = 0 : i64, scratch_operands = 0 : i64, tpu.core_type = #tpu.core_type<tc>, window_params = [{transform_indices = @transform_0, window_bounds = array<i64: 2, 8, 32>}, {pipeline_mode = #tpu.pipeline_mode<synchronous>, transform_indices = @transform_1, window_bounds = array<i64: 32, 16>}, {pipeline_mode = #tpu.pipeline_mode<synchronous>, transform_indices = @transform_2, window_bounds = array<i64: 1, 16>}, {transform_indices = @transform_3, window_bounds = array<i64: 2, 16>}]} {
    %c0 = arith.constant 0 : index
    %c0_0 = arith.constant 0 : index
    %c0_1 = arith.constant 0 : index
    %0 = vector.load %arg1[%c0, %c0_0, %c0_1] : memref<2x8x32xf32, #tpu.memory_space<vmem>>, vector<2x8x32xf32>
    %cst = arith.constant dense<0.000000e+00> : vector<2x32xf32>
    %1 = vector.multi_reduction <add>, %0, %cst [1] : vector<2x8x32xf32> to vector<2x32xf32>
    %cst_2 = arith.constant 1.250000e-01 : f32
    %2 = vector.broadcast %cst_2 : f32 to vector<2x32xf32>
    %3 = arith.mulf %1, %2 : vector<2x32xf32>
    %cst_3 = arith.constant dense<0xFF800000> : vector<2x32xf32>
    %4 = vector.multi_reduction <maximumf>, %0, %cst_3 [1] : vector<2x8x32xf32> to vector<2x32xf32>
    %5 = arith.addf %3, %4 : vector<2x32xf32>
    %c0_4 = arith.constant 0 : index
    %c0_5 = arith.constant 0 : index
    %6 = vector.load %arg2[%c0_4, %c0_5] : memref<32x16xf32, #tpu.memory_space<vmem>>, vector<32x16xf32>
    %cst_6 = arith.constant dense<0.000000e+00> : vector<2x16xf32>
    %7 = tpu.matmul %5, %6, %cst_6 {dimension_numbers = #tpu.dot_dimension_numbers<[1], [0], [0], [1], [0, 0, 1, 1], [], []>} : vector<2x32xf32>, vector<32x16xf32>, vector<2x16xf32> -> vector<2x16xf32>
    %c0_7 = arith.constant 0 : index
    %c0_8 = arith.constant 0 : index
    %8 = vector.load %arg3[%c0_7, %c0_8] : memref<1x16xf32, #tpu.memory_space<vmem>>, vector<1x16xf32>
    %9 = vector.broadcast %8 : vector<1x16xf32> to vector<2x16xf32>
    %10 = arith.addf %7, %9 : vector<2x16xf32>
    %c0_9 = arith.constant 0 : index
    %c0_10 = arith.constant 0 : index
    %11 = vector.load %arg4[%c0_9, %c0_10] : memref<2x16xf32, #tpu.memory_space<vmem>>, vector<2x16xf32>
    tpu.vector_store %arg4[%c0_9, %c0_10], %10 {strides = array<i32>} : memref<2x16xf32, #tpu.memory_space<vmem>>, vector<2x16xf32>,
    return
  }
  func.func @transform_0(%arg0: i32) -> (i32, i32, i32) {
    %c0_i32 = arith.constant 0 : i32
    %c0_i32_0 = arith.constant 0 : i32
    %c0_i32_1 = arith.constant 0 : i32
    return %arg0, %c0_i32, %c0_i32_0 : i32, i32, i32
  }
  func.func @transform_1(%arg0: i32) -> (i32, i32) {
    %c0_i32 = arith.constant 0 : i32
    %c0_i32_0 = arith.constant 0 : i32
    %c0_i32_1 = arith.constant 0 : i32
    return %c0_i32, %c0_i32_0 : i32, i32
  }
  func.func @transform_2(%arg0: i32) -> (i32, i32) {
    %c0_i32 = arith.constant 0 : i32
    %c0_i32_0 = arith.constant 0 : i32
    %c0_i32_1 = arith.constant 0 : i32
    return %c0_i32, %c0_i32_0 : i32, i32
  }
  func.func @transform_3(%arg0: i32) -> (i32, i32) {
    %c0_i32 = arith.constant 0 : i32
    %c0_i32_0 = arith.constant 0 : i32
    return %arg0, %c0_i32 : i32, i32
  }
}

</mosaic_0001>

<bundles_post_ra>
// kernel: tpu_custom_call.1
= control target key start
LH: loop header
LB: loop body
LE: loop exit
PB: predicated region body
PF: predicated region fallthrough
CT: control target
= control target key end

     0   :  { %vm17_vm0 = vcmask 261120   ;;  %v196_v1 = vmov 0.0   ;;  %vm197_vm1 = vmmov 0   ;;  %s248_s0 = inlined_call_operand.vmem [shape: f32[2,8,32], index: 0, kind: input, shape index: {}]   ;;  %s249_s1 = inlined_call_operand.vmem [shape: f32[32,16], index: 1, kind: input, shape index: {}]   ;;  %s250_s2 = inlined_call_operand.vmem [shape: f32[1,16], index: 2, kind: input, shape index: {}]   ;;  %s251_s3 = inlined_call_operand.hbm [shape: f32[2,16], index: 3, kind: output, shape index: {}]  }
   0x1   :  { %v53_v0 = vld [vmem:[%s249_s1 + $0x18] sm:$0xff]  ;;  %160 = vmatprep.subr.mxu0 %v196_v1  ;;  %v52_v2 = vld [vmem:[%s249_s1 + $0x10] sm:$0xff]  ;;  %168 = vmatprep.mubr.msk.f32.mxu0 %vm197_vm1, %v196_v1  ;;  %v15_v3 = vld [vmem:[%s248_s0] sm:$0xff] }
   0x2   :  { %v16_v4 = vld [vmem:[%s248_s0 + $0x8] sm:$0xff]  ;;  %161 = vmatpush3.msra.mxu0 %v53_v0  ;;  %v18_v6 = vsel %vm17_vm0, %v15_v3, 0.0  ;;  %v34_v8 = vsel %vm17_vm0, %v15_v3, -inf }
   0x3   :  { %v51_v5 = vld [vmem:[%s249_s1 + $0x8] sm:$0xff]  ;;  %v25_v7 = vsel %vm17_vm0, %v16_v4, 0.0  ;;  %v41_v9 = vsel %vm17_vm0, %v16_v4, -inf  ;;  %162 = vmatprep.subr.mxu0 %v196_v1  ;;  %v19_v10 = vrot.slane %v18_v6, 4  ;;  %v35_v12 = vrot.slane %v34_v8, 4 }
   0x4   :  { %v26_v11 = vrot.slane %v25_v7, 4  ;;  %v42_v13 = vrot.slane %v41_v9, 4 }
   0x5   :  { %8 = vsyncpa [#allocation3], 0  ;;  %163 = vmatpush3.msra.mxu0 %v52_v2  ;;  %v50_v14 = vld [vmem:[%s249_s1] sm:$0xff]  ;;  %v20_v15 = vadd.f32 %v19_v10, %v18_v6  ;;  %v36_v17 = vmax.f32 %v34_v8, %v35_v12  ;;  %vm63_vm2 = vcmask 1041409   ;;  %s198_s24 = smov [#allocation2]   ;;  %vm137_vm3 = vcmask 123904  }
   0x6   :  { %164 = vmatprep.subr.mxu0 %v196_v1  ;;  %v27_v16 = vadd.f32 %v26_v11, %v25_v7  ;;  %v43_v18 = vmax.f32 %v41_v9, %v42_v13  ;;  %v153_v40 = vld [vmem:[%s250_s2] ss:$0 sm:$0xff]  ;;  %s145_s25 = sshll.u32 %s198_s24, 4  ;;  %s146_s25 = int_to_ptr.vmem [resolvable:$true] %s145_s25 }
   0x7   :  { %165 = vmatpush3.msra.mxu0 %v51_v5  ;;  %v21_v19 = vrot.slane %v20_v15, 2  ;;  %v37_v21 = vrot.slane %v36_v17, 2  ;;  %s174_s26 = scalar_lea.vmem %s146_s25, 32  ;;  %p179_p1 = scmp.lt.s32.totalorder %s146_s25, %s146_s25 }
   0x8   :  { %166 = vmatprep.subr.mxu0 %v196_v1  ;;  %v28_v20 = vrot.slane %v27_v16, 2  ;;  %v44_v22 = vrot.slane %v43_v18, 2  ;;  %p175_p0 = scmp.ne.s32.totalorder %s146_s25, %s174_s26  ;;  %p180_p2 = scmp.lt.s32.totalorder %s174_s26, %s174_s26 }
   0x9   :  { %167 = vmatpush3.msra.mxu0 %v50_v14  ;;  %v22_v23 = vadd.f32 %v21_v19, %v20_v15  ;;  %v38_v25 = vmax.f32 %v36_v17, %v37_v21 }
   0xa   :  { %v29_v24 = vadd.f32 %v28_v20, %v27_v16  ;;  %v45_v26 = vmax.f32 %v43_v18, %v44_v22  ;;  %p181_p3 = por %p180_p2, %p179_p1 }
   0xb   :  { %v23_v27 = vrot.slane %v22_v23, 1  ;;  %v39_v29 = vrot.slane %v38_v25, 1 }
   0xc   :  { %v30_v28 = vrot.slane %v29_v24, 1  ;;  %v46_v30 = vrot.slane %v45_v26, 1  ;;  %p182_p4 = pnand %p181_p3, %p175_p0 }
   0xd   :  { %v24_v31 = vadd.f32 %v23_v27, %v22_v23  ;;  %v40_v33 = vmax.f32 %v38_v25, %v39_v29 }
   0xe   :  { %v31_v32 = vadd.f32 %v30_v28, %v29_v24  ;;  %v47_v34 = vmax.f32 %v45_v26, %v46_v30 }
   0xf   :  { %v32_v35 = vmul.f32 0.125, %v24_v31 }
  0x10   :  { %v33_v36 = vmul.f32 0.125, %v31_v32 }
  0x11   :  { %v48_v37 = vadd.f32 %v40_v33, %v32_v35 }
  0x12   :  { %v49_v38 = vadd.f32 %v47_v34, %v33_v36 }
  0x14   :  { %v64_v39 = vsel %vm63_vm2, %v49_v38, %v48_v37 }
  0x15   :  { %169 = vmatmul.mubr.msk.f32.vlgmr.msra.gmra.mxu0 %vm17_vm0, %v64_v39 }
  0xd5   :  { %v133_v41 = vpop.f32.mrf.mxu0 }
  0xd6   :  { %v134_v42 = vadd.f32 %v153_v40, %v133_v41 }
  0xd7   :  { %v170_v43 = vpop.f32.mrf.mxu0 }
  0xd8   :  { %138 = vst.msk [vmem:[#allocation2] sm:$0x3] %vm137_vm3, %v134_v42 }
  0xd9   :  { %185 = shalt.err (!%p182_p4)
}
  0xda   :  { %148 = dma.vmem_to_hbm [thread:$0]  %s146_s25, 32, %s251_s3, [#allocation3]  }
  0xdb   :  { %194 = dma.done.wait [#allocation3], 32  }
  0xdc   :  { %195 = vsyncadd [#allocation3], 4294967264 }
  0xdd   :  { %152 = vsyncpa [#allocation3], 1 }

</bundles_post_ra>
